<compile_context>
chip_gen: v6e
topology: v6e:2x2x1
jax: 0.10.0
libtpu: 0.0.40
codegen_flags: <defaults>
</compile_context>

<pallas_src>
import jax
import jax.numpy as jnp
from jax.experimental import pallas as pl
from jax.experimental.pallas import tpu as pltpu

BATCH = 256      # amortizes launch overhead; multiple of 8 * num_tiles
D_IN = 128       # contraction dims padded/structured to the MXU tile
D_HID = 128
D_OUT = 128


def _mlp_kernel(x_ref, w1_ref, b1_ref, w2_ref, b2_ref, hid_ref, log_ref):
    """Fused MLP tile.

    hidden = relu(x @ W1 + b1)      (f32 accumulate / f32 epilogue)
    logits = hidden @ W2 + b2       (bf16 MXU inputs, f32 accumulate)
    Both outputs are 128-lane wide -> unmasked full-vreg bf16 stores.
    """
    x = x_ref[...]                                               # (TILE_B, D_IN) bf16
    h = jnp.dot(x, w1_ref[...], preferred_element_type=jnp.float32)
    h = jnp.maximum(h + b1_ref[...], 0.0)                        # f32 epilogue
    y = jnp.dot(h.astype(jnp.bfloat16), w2_ref[...],
                preferred_element_type=jnp.float32) + b2_ref[...]
    hid_ref[...] = h.astype(hid_ref.dtype)                       # bf16 writeback
    log_ref[...] = y.astype(log_ref.dtype)                       # bf16 writeback


def _resident_spec(shape, num_tiles):
    """BlockSpec for an operand that is identical for every grid step."""
    if num_tiles > 1:
        # No point double-buffering a block whose index never changes.
        return pl.BlockSpec(shape, lambda i: (0, 0), pipeline_mode=pl.Buffered(1))
    return pl.BlockSpec(shape, lambda i: (0, 0))


def _num_tiles():
    """One tile per TensorCore: 2 on v7x (dual-TC), 1 on v5e/v6e."""
    try:
        kind = jax.devices()[0].device_kind.lower()
        if "v7" in kind:
            return 2
    except Exception:  # pragma: no cover - defensive fallback
        pass
    return 1


def _mlp_pallas(x, w1, b1, w2, b2, *, num_tiles):
    batch = x.shape[0]
    assert batch % num_tiles == 0
    tile_b = batch // num_tiles
    assert tile_b % 8 == 0  # sublane alignment

    hidden, logits = pl.pallas_call(
        _mlp_kernel,
        out_shape=(
            jax.ShapeDtypeStruct((batch, D_HID), jnp.bfloat16),
            jax.ShapeDtypeStruct((batch, D_OUT), jnp.bfloat16),
        ),
        grid_spec=pltpu.PrefetchScalarGridSpec(
            num_scalar_prefetch=0,
            grid=(num_tiles,),
            in_specs=[
                pl.BlockSpec((tile_b, D_IN), lambda i: (i, 0)),   # x tile
                _resident_spec((D_IN, D_HID), num_tiles),         # W1 (resident)
                _resident_spec((1, D_HID), num_tiles),            # b1
                _resident_spec((D_HID, D_OUT), num_tiles),        # W2 (resident)
                _resident_spec((1, D_OUT), num_tiles),            # b2
            ],
            out_specs=(
                pl.BlockSpec((tile_b, D_HID), lambda i: (i, 0)),  # hidden
                pl.BlockSpec((tile_b, D_OUT), lambda i: (i, 0)),  # logits
            ),
        ),
        compiler_params=pltpu.CompilerParams(
            dimension_semantics=("parallel",),   # v7x: one tile per TensorCore
        ),
    )(x, w1, b1, w2, b2)
    return hidden, logits


def make_inner_model(params, num_tiles):
    """Synthetic inner model whose forward returns a dict (like many HF models)."""
    w1, b1, w2, b2 = params

    def inner_forward(x):
        hidden, logits = _mlp_pallas(x, w1, b1, w2, b2, num_tiles=num_tiles)
        return {"hidden": hidden, "logits": logits}

    return inner_forward


def trace_model_wrapper(inner_model):
    """JAX equivalent of TraceModelWrapper.forward."""

    def forward(*input_data, **input_dict):
        out = inner_model(*input_data, **input_dict)
        if isinstance(out, dict):
            return list(out.values())
        return out

    return forward


if __name__ == "__main__":
    key = jax.random.PRNGKey(0)
    kx, k1, k2, k3, k4 = jax.random.split(key, 5)

    # Deterministic parameter init. Weights/activations stored bf16 (MXU inputs),
    # biases stay f32 (epilogue precision).
    w1 = (jax.random.normal(k1, (D_IN, D_HID), dtype=jnp.float32) * 0.05).astype(jnp.bfloat16)
    b1 = jax.random.normal(k2, (1, D_HID), dtype=jnp.float32) * 0.01
    w2 = (jax.random.normal(k3, (D_HID, D_OUT), dtype=jnp.float32) * 0.05).astype(jnp.bfloat16)
    b2 = jax.random.normal(k4, (1, D_OUT), dtype=jnp.float32) * 0.01

    x = jax.random.normal(kx, (BATCH, D_IN), dtype=jnp.float32).astype(jnp.bfloat16)

    num_tiles = _num_tiles()
    model = trace_model_wrapper(make_inner_model((w1, b1, w2, b2), num_tiles))
    outputs = model(x)  # list of dict values: [hidden, logits]
    outputs = [jax.block_until_ready(o) for o in outputs]

    # Correctness check against a plain-JAX reference using the same bf16
    # MXU inputs / f32 accumulation recipe (kernel outputs are bf16-rounded).
    h_ref = jnp.maximum(
        jnp.dot(x, w1, preferred_element_type=jnp.float32) + b1, 0.0)
    y_ref = jnp.dot(h_ref.astype(jnp.bfloat16), w2,
                    preferred_element_type=jnp.float32) + b2

    assert isinstance(outputs, list) and len(outputs) == 2
    assert outputs[0].shape == (BATCH, D_HID) and outputs[0].dtype == jnp.bfloat16
    assert outputs[1].shape == (BATCH, D_OUT) and outputs[1].dtype == jnp.bfloat16
    assert jnp.allclose(outputs[0].astype(jnp.float32), h_ref, atol=2e-2, rtol=2e-2)
    assert jnp.allclose(outputs[1].astype(jnp.float32), y_ref, atol=2e-2, rtol=2e-2)

    print("KERNEL_OK")
</pallas_src>

<mosaic_0001>
module attributes {stable_mosaic.version = 11 : i64} {
  func.func @_mlp_kernel(%arg0: i32, %arg1: memref<256x128xbf16, #tpu.memory_space<vmem>>, %arg2: memref<128x128xbf16, #tpu.memory_space<vmem>>, %arg3: memref<1x128xf32, #tpu.memory_space<vmem>>, %arg4: memref<128x128xbf16, #tpu.memory_space<vmem>>, %arg5: memref<1x128xf32, #tpu.memory_space<vmem>>, %arg6: memref<256x128xbf16, #tpu.memory_space<vmem>>, %arg7: memref<256x128xbf16, #tpu.memory_space<vmem>>) attributes {dimension_semantics = [#tpu.dimension_semantics<parallel>], iteration_bounds = array<i64: 1>, scalar_prefetch = 0 : i64, scratch_operands = 0 : i64, tpu.core_type = #tpu.core_type<tc>, window_params = [{transform_indices = @transform_0, window_bounds = array<i64: 256, 128>}, {pipeline_mode = #tpu.pipeline_mode<synchronous>, transform_indices = @transform_1, window_bounds = array<i64: 128, 128>}, {pipeline_mode = #tpu.pipeline_mode<synchronous>, transform_indices = @transform_2, window_bounds = array<i64: 1, 128>}, {pipeline_mode = #tpu.pipeline_mode<synchronous>, transform_indices = @transform_3, window_bounds = array<i64: 128, 128>}, {pipeline_mode = #tpu.pipeline_mode<synchronous>, transform_indices = @transform_4, window_bounds = array<i64: 1, 128>}, {transform_indices = @transform_5, window_bounds = array<i64: 256, 128>}, {transform_indices = @transform_6, window_bounds = array<i64: 256, 128>}]} {
    %c0 = arith.constant 0 : index
    %c0_0 = arith.constant 0 : index
    %0 = vector.load %arg1[%c0, %c0_0] : memref<256x128xbf16, #tpu.memory_space<vmem>>, vector<256x128xbf16>
    %c0_1 = arith.constant 0 : index
    %c0_2 = arith.constant 0 : index
    %1 = vector.load %arg2[%c0_1, %c0_2] : memref<128x128xbf16, #tpu.memory_space<vmem>>, vector<128x128xbf16>
    %cst = arith.constant dense<0.000000e+00> : vector<256x128xf32>
    %2 = tpu.matmul %0, %1, %cst {dimension_numbers = #tpu.dot_dimension_numbers<[1], [0], [0], [1], [0, 0, 1, 1], [], []>} : vector<256x128xbf16>, vector<128x128xbf16>, vector<256x128xf32> -> vector<256x128xf32>
    %c0_3 = arith.constant 0 : index
    %c0_4 = arith.constant 0 : index
    %3 = vector.load %arg3[%c0_3, %c0_4] : memref<1x128xf32, #tpu.memory_space<vmem>>, vector<1x128xf32>
    %4 = vector.broadcast %3 : vector<1x128xf32> to vector<256x128xf32>
    %5 = arith.addf %2, %4 : vector<256x128xf32>
    %cst_5 = arith.constant 0.000000e+00 : f32
    %6 = vector.broadcast %cst_5 : f32 to vector<256x128xf32>
    %7 = arith.maximumf %5, %6 : vector<256x128xf32>
    %8 = arith.truncf %7 : vector<256x128xf32> to vector<256x128xbf16>
    %c0_6 = arith.constant 0 : index
    %c0_7 = arith.constant 0 : index
    %9 = vector.load %arg4[%c0_6, %c0_7] : memref<128x128xbf16, #tpu.memory_space<vmem>>, vector<128x128xbf16>
    %cst_8 = arith.constant dense<0.000000e+00> : vector<256x128xf32>
    %10 = tpu.matmul %8, %9, %cst_8 {dimension_numbers = #tpu.dot_dimension_numbers<[1], [0], [0], [1], [0, 0, 1, 1], [], []>} : vector<256x128xbf16>, vector<128x128xbf16>, vector<256x128xf32> -> vector<256x128xf32>
    %c0_9 = arith.constant 0 : index
    %c0_10 = arith.constant 0 : index
    %11 = vector.load %arg5[%c0_9, %c0_10] : memref<1x128xf32, #tpu.memory_space<vmem>>, vector<1x128xf32>
    %12 = vector.broadcast %11 : vector<1x128xf32> to vector<256x128xf32>
    %13 = arith.addf %10, %12 : vector<256x128xf32>
    %14 = arith.truncf %7 : vector<256x128xf32> to vector<256x128xbf16>
    %c0_11 = arith.constant 0 : index
    %c0_12 = arith.constant 0 : index
    %15 = vector.load %arg6[%c0_11, %c0_12] : memref<256x128xbf16, #tpu.memory_space<vmem>>, vector<256x128xbf16>
    tpu.vector_store %arg6[%c0_11, %c0_12], %14 {strides = array<i32>} : memref<256x128xbf16, #tpu.memory_space<vmem>>, vector<256x128xbf16>,
    %16 = arith.truncf %13 : vector<256x128xf32> to vector<256x128xbf16>
    %c0_13 = arith.constant 0 : index
    %c0_14 = arith.constant 0 : index
    %17 = vector.load %arg7[%c0_13, %c0_14] : memref<256x128xbf16, #tpu.memory_space<vmem>>, vector<256x128xbf16>
    tpu.vector_store %arg7[%c0_13, %c0_14], %16 {strides = array<i32>} : memref<256x128xbf16, #tpu.memory_space<vmem>>, vector<256x128xbf16>,
    return
  }
  func.func @transform_0(%arg0: i32) -> (i32, i32) {
    %c0_i32 = arith.constant 0 : i32
    %c0_i32_0 = arith.constant 0 : i32
    return %arg0, %c0_i32 : i32, i32
  }
  func.func @transform_1(%arg0: i32) -> (i32, i32) {
    %c0_i32 = arith.constant 0 : i32
    %c0_i32_0 = arith.constant 0 : i32
    %c0_i32_1 = arith.constant 0 : i32
    return %c0_i32, %c0_i32_0 : i32, i32
  }
  func.func @transform_2(%arg0: i32) -> (i32, i32) {
    %c0_i32 = arith.constant 0 : i32
    %c0_i32_0 = arith.constant 0 : i32
    %c0_i32_1 = arith.constant 0 : i32
    return %c0_i32, %c0_i32_0 : i32, i32
  }
  func.func @transform_3(%arg0: i32) -> (i32, i32) {
    %c0_i32 = arith.constant 0 : i32
    %c0_i32_0 = arith.constant 0 : i32
    %c0_i32_1 = arith.constant 0 : i32
    return %c0_i32, %c0_i32_0 : i32, i32
  }
  func.func @transform_4(%arg0: i32) -> (i32, i32) {
    %c0_i32 = arith.constant 0 : i32
    %c0_i32_0 = arith.constant 0 : i32
    %c0_i32_1 = arith.constant 0 : i32
    return %c0_i32, %c0_i32_0 : i32, i32
  }
  func.func @transform_5(%arg0: i32) -> (i32, i32) {
    %c0_i32 = arith.constant 0 : i32
    %c0_i32_0 = arith.constant 0 : i32
    return %arg0, %c0_i32 : i32, i32
  }
  func.func @transform_6(%arg0: i32) -> (i32, i32) {
    %c0_i32 = arith.constant 0 : i32
    %c0_i32_0 = arith.constant 0 : i32
    return %arg0, %c0_i32 : i32, i32
  }
}

</mosaic_0001>

<bundles_post_ra>
// kernel: tpu_custom_call.1
= control target key start
LH: loop header
LB: loop body
LE: loop exit
PB: predicated region body
PF: predicated region fallthrough
CT: control target
= control target key end

     0   :  { %12 = vsyncpa [#allocation3], 0  ;;  %s1833_s0 = inlined_call_operand.hbm [shape: bf16[256,128], index: 0, kind: input, shape index: {}]   ;;  %s1834_s1 = inlined_call_operand.hbm [shape: bf16[128,128], index: 1, kind: input, shape index: {}]   ;;  %s1835_s2 = inlined_call_operand.vmem [shape: f32[1,128], index: 2, kind: input, shape index: {}]   ;;  %s1836_s3 = inlined_call_operand.hbm [shape: bf16[128,128], index: 3, kind: input, shape index: {}]   ;;  %s1837_s4 = inlined_call_operand.vmem [shape: f32[1,128], index: 4, kind: input, shape index: {}]   ;;  %s1838_s5 = inlined_call_operand.hbm [shape: bf16[256,128], index: 5, kind: output, shape index: {0}]   ;;  %s1839_s6 = inlined_call_operand.hbm [shape: bf16[256,128], index: 6, kind: output, shape index: {1}]  }
   0x1   :  { %13 = vsyncpa [#allocation6], 0 }
   0x2   :  { %14 = vsyncpa [#allocation4], 0 }
   0x3   :  { %15 = vsyncpa [#allocation10], 0  ;;  %s1687_s21 = smov [#allocation5]   ;;  %s1688_s23 = smov [#allocation2]  }
   0x4   :  { %s33_s22 = sshll.u32 %s1687_s21, 4  ;;  %s21_s24 = sshll.u32 %s1688_s23, 4  ;;  %s34_s22 = int_to_ptr.vmem [resolvable:$true] %s33_s22  ;;  %s22_s24 = int_to_ptr.vmem [resolvable:$true] %s21_s24 }
   0x5   :  { %s1587_s25 = scalar_lea.vmem %s34_s22, 1024  ;;  %p1592_p1 = scmp.lt.s32.totalorder %s34_s22, %s34_s22 }
   0x6   :  { %p1588_p0 = scmp.ne.s32.totalorder %s34_s22, %s1587_s25  ;;  %p1593_p2 = scmp.lt.s32.totalorder %s1587_s25, %s1587_s25 }
   0x8   :  { %p1594_p3 = por %p1593_p2, %p1592_p1 }
   0xa   :  { %p1595_p4 = pnand %p1594_p3, %p1588_p0 }
   0xc   :  { %1598 = shalt.err (!%p1595_p4)
}
   0xd   :  { %s1689_s26 = smov 64   ;;  %s1690_s27 = smov 4  }
   0xe   :  { %39 = dma.hbm_to_vmem [thread:$0]  %s1834_s1, 1024, %s34_s22, [#allocation6], %s1689_s26, %s1689_s26, %s1690_s27  }
   0xf   :  { %s1607_s30 = scalar_lea.vmem %s22_s24, 2048  ;;  %p1612_p6 = scmp.lt.s32.totalorder %s22_s24, %s22_s24 }
  0x10   :  { %p1608_p5 = scmp.ne.s32.totalorder %s22_s24, %s1607_s30  ;;  %p1613_p7 = scmp.lt.s32.totalorder %s1607_s30, %s1607_s30 }
  0x12   :  { %p1614_p8 = por %p1613_p7, %p1612_p6 }
  0x14   :  { %p1615_p9 = pnand %p1614_p8, %p1608_p5 }
  0x16   :  { %1618 = shalt.err (!%p1615_p9)
}
  0x17   :  { %27 = dma.hbm_to_vmem [thread:$0]  %s1833_s0, 2048, %s22_s24, [#allocation3], %s1689_s26, %s1689_s26, %s1690_s27  }
  0x18   :  { %s1691_s9 = smov [#allocation7]  }
  0x19   :  { %s47_s10 = sshll.u32 %s1691_s9, 4  ;;  %s48_s10 = int_to_ptr.vmem [resolvable:$true] %s47_s10 }
  0x1a   :  { %s1627_s11 = scalar_lea.vmem %s48_s10, 1024  ;;  %p1632_p11 = scmp.lt.s32.totalorder %s48_s10, %s48_s10 }
  0x1b   :  { %p1628_p10 = scmp.ne.s32.totalorder %s48_s10, %s1627_s11  ;;  %p1633_p12 = scmp.lt.s32.totalorder %s1627_s11, %s1627_s11 }
  0x1d   :  { %p1634_p13 = por %p1633_p12, %p1632_p11 }
  0x1f   :  { %p1635_p0 = pnand %p1634_p13, %p1628_p10 }
  0x21   :  { %1638 = shalt.err (!%p1635_p0)
}
  0x22   :  { %53 = dma.hbm_to_vmem [thread:$0]  %s1836_s3, 1024, %s48_s10, [#allocation6], %s1689_s26, %s1689_s26, %s1690_s27  }
  0x23   :  { %1679 = dma.done.wait [#allocation3], 2048  }
  0x24   :  { %1680 = vsyncadd [#allocation3], 4294965248 }
  0x25   :  { %1681 = dma.done.wait [#allocation6], 2048  }
  0x26   :  { %1682 = vsyncadd [#allocation6], 4294965248  ;;  %v1547_v0 = vld [vmem:[#allocation5 + $0x38] sm:$0xff]   ;;  %v1548_v1 = vld [vmem:[#allocation5 + $0x30] sm:$0xff]  }
  0x27   :  { %1444 = vmatprep.subr.bf16.mxu0 %v1547_v0  ;;  %v1549_v2 = vld [vmem:[#allocation5 + $0x28] sm:$0xff]   ;;  %v1550_v3 = vld [vmem:[#allocation5 + $0x20] sm:$0xff]   ;;  %v1551_v5 = vld [vmem:[#allocation5 + $0x18] sm:$0xff]  }
  0x28   :  { %1445 = vmatpush3.bf16.msra.mxu0 %v1547_v0  ;;  %v1555_v4 = vld [vmem:[#allocation2] sm:$0xff]   ;;  %v1552_v6 = vld [vmem:[#allocation5 + $0x10] sm:$0xff]   ;;  %v1553_v7 = vld [vmem:[#allocation5 + $0x8] sm:$0xff]  }
  0x29   :  { %1446 = vmatprep.subr.bf16.mxu0 %v1548_v1  ;;  %1460 = vmatprep.mubr.bf16.mxu0 %v1555_v4  ;;  %v1554_v8 = vld [vmem:[#allocation5] sm:$0xff]   ;;  %v1571_v9 = vld [vmem:[#allocation7 + $0x38] sm:$0xff]   ;;  %v1572_v10 = vld [vmem:[#allocation7 + $0x30] sm:$0xff]  }
  0x2a   :  { %1492 = vmatprep.subr.bf16.mxu1 %v1571_v9  ;;  %v1556_v11 = vld [vmem:[#allocation2 + $0x8] sm:$0xff]   ;;  %v1557_v13 = vld [vmem:[#allocation2 + $0x10] sm:$0xff]   ;;  %v1574_v14 = vld [vmem:[#allocation7 + $0x20] sm:$0xff]  }
  0x2b   :  { %1493 = vmatpush3.bf16.msra.mxu1 %v1571_v9  ;;  %v1573_v12 = vld [vmem:[#allocation7 + $0x28] sm:$0xff]   ;;  %v1575_v15 = vld [vmem:[#allocation7 + $0x18] sm:$0xff]   ;;  %v1559_v17 = vld [vmem:[#allocation2 + $0x20] sm:$0xff]  }
  0x2c   :  { %1447 = vmatpush3.bf16.msra.mxu0 %v1548_v1  ;;  %1494 = vmatprep.subr.bf16.mxu1 %v1572_v10  ;;  %v1558_v16 = vld [vmem:[#allocation2 + $0x18] sm:$0xff]   ;;  %v1560_v18 = vld [vmem:[#allocation2 + $0x28] sm:$0xff]   ;;  %v1561_v19 = vld [vmem:[#allocation2 + $0x30] sm:$0xff]  }
  0x2d   :  { %1448 = vmatprep.subr.bf16.mxu0 %v1549_v2  ;;  %v1562_v20 = vld [vmem:[#allocation2 + $0x38] sm:$0xff]   ;;  %v1563_v21 = vld [vmem:[#allocation2 + $0x40] sm:$0xff]   ;;  %v1564_v22 = vld [vmem:[#allocation2 + $0x48] sm:$0xff]  }
  0x2e   :  { %v1565_v23 = vld [vmem:[#allocation2 + $0x50] sm:$0xff]   ;;  %v1566_v24 = vld [vmem:[#allocation2 + $0x58] sm:$0xff]   ;;  %v1567_v25 = vld [vmem:[#allocation2 + $0x60] sm:$0xff]  }
  0x2f   :  { %1495 = vmatpush3.bf16.msra.mxu1 %v1572_v10  ;;  %v1568_v26 = vld [vmem:[#allocation2 + $0x68] sm:$0xff]   ;;  %v1569_v27 = vld [vmem:[#allocation2 + $0x70] sm:$0xff]   ;;  %v1570_v28 = vld [vmem:[#allocation2 + $0x78] sm:$0xff]  }
  0x30   :  { %1449 = vmatpush3.bf16.msra.mxu0 %v1549_v2  ;;  %1496 = vmatprep.subr.bf16.mxu1 %v1573_v12  ;;  %v1576_v29 = vld [vmem:[#allocation7 + $0x10] sm:$0xff]   ;;  %v1577_v30 = vld [vmem:[#allocation7 + $0x8] sm:$0xff]   ;;  %v1578_v31 = vld [vmem:[#allocation7] sm:$0xff]  }
  0x31   :  { %1450 = vmatprep.subr.bf16.mxu0 %v1550_v3  ;;  %v1750_v33 = vld [vmem:[%s1835_s2] ss:$0 sm:$0xff]  ;;  %s1692_s2 = smov [#allocation8]  }
  0x32   :  { %s1015_s13 = sshll.u32 %s1692_s2, 4  ;;  %s1016_s13 = int_to_ptr.vmem [resolvable:$true] %s1015_s13 }
  0x33   :  { %1497 = vmatpush3.bf16.msra.mxu1 %v1573_v12  ;;  %s1639_s14 = scalar_lea.vmem %s1016_s13, 2048  ;;  %p1644_p2 = scmp.lt.s32.totalorder %s1016_s13, %s1016_s13 }
  0x34   :  { %1451 = vmatpush3.bf16.msra.mxu0 %v1550_v3  ;;  %1498 = vmatprep.subr.bf16.mxu1 %v1574_v14  ;;  %p1640_p1 = scmp.ne.s32.totalorder %s1016_s13, %s1639_s14  ;;  %p1645_p3 = scmp.lt.s32.totalorder %s1639_s14, %s1639_s14 }
  0x35   :  { %1452 = vmatprep.subr.bf16.mxu0 %v1551_v5 }
  0x36   :  { %p1646_p4 = por %p1645_p3, %p1644_p2 }
  0x37   :  { %1499 = vmatpush3.bf16.msra.mxu1 %v1574_v14 }
  0x38   :  { %1453 = vmatpush3.bf16.msra.mxu0 %v1551_v5  ;;  %1500 = vmatprep.subr.bf16.mxu1 %v1575_v15  ;;  %p1647_p5 = pnand %p1646_p4, %p1640_p1 }
  0x39   :  { %1454 = vmatprep.subr.bf16.mxu0 %v1552_v6 }
  0x3b   :  { %1501 = vmatpush3.bf16.msra.mxu1 %v1575_v15 }
  0x3c   :  { %1455 = vmatpush3.bf16.msra.mxu0 %v1552_v6  ;;  %1502 = vmatprep.subr.bf16.mxu1 %v1576_v29 }
  0x3d   :  { %1456 = vmatprep.subr.bf16.mxu0 %v1553_v7 }
  0x3f   :  { %1503 = vmatpush3.bf16.msra.mxu1 %v1576_v29 }
  0x40   :  { %1457 = vmatpush3.bf16.msra.mxu0 %v1553_v7  ;;  %1504 = vmatprep.subr.bf16.mxu1 %v1577_v30 }
  0x41   :  { %1458 = vmatprep.subr.bf16.mxu0 %v1554_v8 }
  0x43   :  { %1505 = vmatpush3.bf16.msra.mxu1 %v1577_v30 }
  0x44   :  { %1459 = vmatpush3.bf16.msra.mxu0 %v1554_v8  ;;  %1506 = vmatprep.subr.bf16.mxu1 %v1578_v31 }
  0x47   :  { %1461 = vmatmul.mubr.bf16.vlgmr.msra.gmra.mxu0 %v1556_v11  ;;  %1507 = vmatpush3.bf16.msra.mxu1 %v1578_v31 }
  0x48   :  { %1464 = vmatprep.mubr.bf16.mxu0 %v1557_v13 }
  0x4f   :  { %1465 = vmatmul.mubr.bf16.gmra.mxu0 %v1558_v16 }
  0x50   :  { %1468 = vmatprep.mubr.bf16.mxu0 %v1559_v17 }
  0x57   :  { %1469 = vmatmul.mubr.bf16.gmra.mxu0 %v1560_v18 }
  0x58   :  { %1472 = vmatprep.mubr.bf16.mxu0 %v1561_v19 }
  0x5f   :  { %1473 = vmatmul.mubr.bf16.gmra.mxu0 %v1562_v20 }
  0x60   :  { %1476 = vmatprep.mubr.bf16.mxu0 %v1563_v21 }
  0x67   :  { %1477 = vmatmul.mubr.bf16.gmra.mxu0 %v1564_v22 }
  0x68   :  { %1480 = vmatprep.mubr.bf16.mxu0 %v1565_v23 }
  0x6f   :  { %1481 = vmatmul.mubr.bf16.gmra.mxu0 %v1566_v24 }
  0x70   :  { %1484 = vmatprep.mubr.bf16.mxu0 %v1567_v25 }
  0x77   :  { %1485 = vmatmul.mubr.bf16.gmra.mxu0 %v1568_v26 }
  0x78   :  { %1488 = vmatprep.mubr.bf16.mxu0 %v1569_v27 }
  0x7f   :  { %1489 = vmatmul.mubr.bf16.gmra.mxu0 %v1570_v28 }
 0x107   :  { %v1462_v32 = vpop.f32.mrf.mxu0 }
 0x108   :  { %v308_v35 = vadd.f32 %v1462_v32, %v1750_v33 }
 0x109   :  { %v299_v34 = vpop.f32.mrf.mxu0 }
 0x10a   :  { %v300_v37 = vadd.f32 %v1750_v33, %v299_v34  ;;  %v428_v40 = vmax.f32 %v308_v35, 0.0 }
 0x10b   :  { %v1463_v36 = vpop.f32.mrf.mxu0 }
 0x10c   :  { %v311_v38 = vadd.f32 %v1463_v36, %v1750_v33  ;;  %v426_v44 = vmax.f32 %v300_v37, 0.0 }
 0x10d   :  { %v302_v39 = vpop.f32.mrf.mxu0 }
 0x10e   :  { %v429_v41 = vmax.f32 %v311_v38, 0.0  ;;  %v303_v42 = vadd.f32 %v1750_v33, %v302_v39 }
 0x10f   :  { %v1466_v43 = vpop.f32.mrf.mxu0 }
 0x110   :  { %v459_v45 = vpack.c.bf16 %v429_v41, %v428_v40  ;;  %v427_v46 = vmax.f32 %v303_v42, 0.0  ;;  %v324_v48 = vadd.f32 %v1466_v43, %v1750_v33 }
 0x111   :  { %v315_v47 = vpop.f32.mrf.mxu0 }
 0x112   :  { %1366 = vst [vmem:[#allocation8 + $0x8] sm:$0xff] %v459_v45   ;;  %v458_v49 = vpack.c.bf16 %v427_v46, %v426_v44  ;;  %v316_v51 = vadd.f32 %v1750_v33, %v315_v47  ;;  %v432_v54 = vmax.f32 %v324_v48, 0.0 }
 0x113   :  { %v1467_v50 = vpop.f32.mrf.mxu0 }
 0x114   :  { %v327_v52 = vadd.f32 %v1467_v50, %v1750_v33  ;;  %1508 = vmatprep.mubr.bf16.mxu1 %v458_v49  ;;  %1210 = vst [vmem:[#allocation8] sm:$0xff] %v458_v49   ;;  %v430_v58 = vmax.f32 %v316_v51, 0.0 }
 0x115   :  { %v318_v53 = vpop.f32.mrf.mxu0  ;;  %1509 = vmatmul.mubr.bf16.vlgmr.msra.gmra.mxu1 %v459_v45 }
 0x116   :  { %v433_v55 = vmax.f32 %v327_v52, 0.0  ;;  %v319_v56 = vadd.f32 %v1750_v33, %v318_v53 }
 0x117   :  { %v1470_v57 = vpop.f32.mrf.mxu0 }
 0x118   :  { %v461_v59 = vpack.c.bf16 %v433_v55, %v432_v54  ;;  %v431_v60 = vmax.f32 %v319_v56, 0.0  ;;  %v340_v63 = vadd.f32 %v1470_v57, %v1750_v33 }
 0x119   :  { %v331_v61 = vpop.f32.mrf.mxu0 }
 0x11a   :  { %1368 = vst [vmem:[#allocation8 + $0x18] sm:$0xff] %v461_v59   ;;  %v460_v62 = vpack.c.bf16 %v431_v60, %v430_v58  ;;  %v332_v1 = vadd.f32 %v1750_v33, %v331_v61  ;;  %v436_v4 = vmax.f32 %v340_v63, 0.0 }
 0x11b   :  { %v1471_v0 = vpop.f32.mrf.mxu0 }
 0x11c   :  { %1367 = vst [vmem:[#allocation8 + $0x10] sm:$0xff] %v460_v62   ;;  %v343_v2 = vadd.f32 %v1471_v0, %v1750_v33  ;;  %1512 = vmatprep.mubr.bf16.mxu1 %v460_v62  ;;  %v434_v8 = vmax.f32 %v332_v1, 0.0 }
 0x11d   :  { %v334_v3 = vpop.f32.mrf.mxu0  ;;  %1513 = vmatmul.mubr.bf16.gmra.mxu1 %v461_v59 }
 0x11e   :  { %v437_v5 = vmax.f32 %v343_v2, 0.0  ;;  %v335_v6 = vadd.f32 %v1750_v33, %v334_v3 }
 0x11f   :  { %v1474_v7 = vpop.f32.mrf.mxu0 }
 0x120   :  { %v463_v9 = vpack.c.bf16 %v437_v5, %v436_v4  ;;  %v435_v10 = vmax.f32 %v335_v6, 0.0  ;;  %v356_v13 = vadd.f32 %v1474_v7, %v1750_v33 }
 0x121   :  { %v347_v11 = vpop.f32.mrf.mxu0 }
 0x122   :  { %1370 = vst [vmem:[#allocation8 + $0x28] sm:$0xff] %v463_v9   ;;  %v462_v12 = vpack.c.bf16 %v435_v10, %v434_v8  ;;  %v348_v15 = vadd.f32 %v1750_v33, %v347_v11  ;;  %v440_v18 = vmax.f32 %v356_v13, 0.0 }
 0x123   :  { %v1475_v14 = vpop.f32.mrf.mxu0 }
 0x124   :  { %1369 = vst [vmem:[#allocation8 + $0x20] sm:$0xff] %v462_v12   ;;  %v359_v16 = vadd.f32 %v1475_v14, %v1750_v33  ;;  %1516 = vmatprep.mubr.bf16.mxu1 %v462_v12  ;;  %v438_v22 = vmax.f32 %v348_v15, 0.0 }
 0x125   :  { %v350_v17 = vpop.f32.mrf.mxu0  ;;  %1517 = vmatmul.mubr.bf16.gmra.mxu1 %v463_v9 }
 0x126   :  { %v441_v19 = vmax.f32 %v359_v16, 0.0  ;;  %v351_v20 = vadd.f32 %v1750_v33, %v350_v17 }
 0x127   :  { %v1478_v21 = vpop.f32.mrf.mxu0 }
 0x128   :  { %v465_v23 = vpack.c.bf16 %v441_v19, %v440_v18  ;;  %v439_v24 = vmax.f32 %v351_v20, 0.0  ;;  %v372_v27 = vadd.f32 %v1478_v21, %v1750_v33 }
 0x129   :  { %v363_v25 = vpop.f32.mrf.mxu0 }
 0x12a   :  { %1372 = vst [vmem:[#allocation8 + $0x38] sm:$0xff] %v465_v23   ;;  %v464_v26 = vpack.c.bf16 %v439_v24, %v438_v22  ;;  %v364_v29 = vadd.f32 %v1750_v33, %v363_v25  ;;  %v444_v32 = vmax.f32 %v372_v27, 0.0 }
 0x12b   :  { %v1479_v28 = vpop.f32.mrf.mxu0 }
 0x12c   :  { %1371 = vst [vmem:[#allocation8 + $0x30] sm:$0xff] %v464_v26   ;;  %v375_v30 = vadd.f32 %v1479_v28, %v1750_v33  ;;  %1520 = vmatprep.mubr.bf16.mxu1 %v464_v26  ;;  %v442_v37 = vmax.f32 %v364_v29, 0.0 }
 0x12d   :  { %v366_v31 = vpop.f32.mrf.mxu0  ;;  %1521 = vmatmul.mubr.bf16.gmra.mxu1 %v465_v23 }
 0x12e   :  { %v445_v34 = vmax.f32 %v375_v30, 0.0  ;;  %v367_v35 = vadd.f32 %v1750_v33, %v366_v31 }
 0x12f   :  { %v1482_v36 = vpop.f32.mrf.mxu0 }
 0x130   :  { %v467_v38 = vpack.c.bf16 %v445_v34, %v444_v32  ;;  %v443_v39 = vmax.f32 %v367_v35, 0.0  ;;  %v388_v42 = vadd.f32 %v1482_v36, %v1750_v33 }
 0x131   :  { %v379_v40 = vpop.f32.mrf.mxu0 }
 0x132   :  { %1374 = vst [vmem:[#allocation8 + $0x48] sm:$0xff] %v467_v38   ;;  %v466_v41 = vpack.c.bf16 %v443_v39, %v442_v37  ;;  %v380_v44 = vadd.f32 %v1750_v33, %v379_v40  ;;  %v448_v47 = vmax.f32 %v388_v42, 0.0 }
 0x133   :  { %v1483_v43 = vpop.f32.mrf.mxu0 }
 0x134   :  { %1373 = vst [vmem:[#allocation8 + $0x40] sm:$0xff] %v466_v41   ;;  %v391_v45 = vadd.f32 %v1483_v43, %v1750_v33  ;;  %1524 = vmatprep.mubr.bf16.mxu1 %v466_v41  ;;  %v446_v51 = vmax.f32 %v380_v44, 0.0 }
 0x135   :  { %v382_v46 = vpop.f32.mrf.mxu0  ;;  %1525 = vmatmul.mubr.bf16.gmra.mxu1 %v467_v38 }
 0x136   :  { %v449_v48 = vmax.f32 %v391_v45, 0.0  ;;  %v383_v49 = vadd.f32 %v1750_v33, %v382_v46 }
 0x137   :  { %v1486_v50 = vpop.f32.mrf.mxu0 }
 0x138   :  { %v469_v52 = vpack.c.bf16 %v449_v48, %v448_v47  ;;  %v447_v53 = vmax.f32 %v383_v49, 0.0  ;;  %v404_v56 = vadd.f32 %v1486_v50, %v1750_v33 }
 0x139   :  { %v395_v54 = vpop.f32.mrf.mxu0 }
 0x13a   :  { %1376 = vst [vmem:[#allocation8 + $0x58] sm:$0xff] %v469_v52   ;;  %v468_v55 = vpack.c.bf16 %v447_v53, %v446_v51  ;;  %v396_v58 = vadd.f32 %v1750_v33, %v395_v54  ;;  %v452_v61 = vmax.f32 %v404_v56, 0.0 }
 0x13b   :  { %v1487_v57 = vpop.f32.mrf.mxu0 }
 0x13c   :  { %1375 = vst [vmem:[#allocation8 + $0x50] sm:$0xff] %v468_v55   ;;  %v407_v59 = vadd.f32 %v1487_v57, %v1750_v33  ;;  %1528 = vmatprep.mubr.bf16.mxu1 %v468_v55  ;;  %v450_v1 = vmax.f32 %v396_v58, 0.0 }
 0x13d   :  { %v398_v60 = vpop.f32.mrf.mxu0  ;;  %1529 = vmatmul.mubr.bf16.gmra.mxu1 %v469_v52 }
 0x13e   :  { %v453_v62 = vmax.f32 %v407_v59, 0.0  ;;  %v399_v63 = vadd.f32 %v1750_v33, %v398_v60 }
 0x13f   :  { %v1490_v0 = vpop.f32.mrf.mxu0 }
 0x140   :  { %v471_v2 = vpack.c.bf16 %v453_v62, %v452_v61  ;;  %v451_v3 = vmax.f32 %v399_v63, 0.0  ;;  %v420_v6 = vadd.f32 %v1490_v0, %v1750_v33 }
 0x141   :  { %v411_v4 = vpop.f32.mrf.mxu0 }
 0x142   :  { %1378 = vst [vmem:[#allocation8 + $0x68] sm:$0xff] %v471_v2   ;;  %v470_v5 = vpack.c.bf16 %v451_v3, %v450_v1  ;;  %v412_v8 = vadd.f32 %v1750_v33, %v411_v4  ;;  %v456_v11 = vmax.f32 %v420_v6, 0.0 }
 0x143   :  { %v1491_v7 = vpop.f32.mrf.mxu0 }
 0x144   :  { %1377 = vst [vmem:[#allocation8 + $0x60] sm:$0xff] %v470_v5   ;;  %v423_v9 = vadd.f32 %v1491_v7, %v1750_v33  ;;  %1532 = vmatprep.mubr.bf16.mxu1 %v470_v5  ;;  %v454_v14 = vmax.f32 %v412_v8, 0.0 }
 0x145   :  { %v414_v10 = vpop.f32.mrf.mxu0  ;;  %1533 = vmatmul.mubr.bf16.gmra.mxu1 %v471_v2 }
 0x146   :  { %v457_v12 = vmax.f32 %v423_v9, 0.0  ;;  %v415_v13 = vadd.f32 %v1750_v33, %v414_v10 }
 0x148   :  { %v473_v15 = vpack.c.bf16 %v457_v12, %v456_v11  ;;  %v455_v16 = vmax.f32 %v415_v13, 0.0 }
 0x14a   :  { %1380 = vst [vmem:[#allocation8 + $0x78] sm:$0xff] %v473_v15   ;;  %v472_v17 = vpack.c.bf16 %v455_v16, %v454_v14 }
 0x14c   :  { %1379 = vst [vmem:[#allocation8 + $0x70] sm:$0xff] %v472_v17   ;;  %1536 = vmatprep.mubr.bf16.mxu1 %v472_v17 }
 0x14d   :  { %1537 = vmatmul.mubr.bf16.gmra.mxu1 %v473_v15 }
 0x14e   :  { %1650 = shalt.err (!%p1647_p5)
}
 0x14f   :  { %1021 = dma.vmem_to_hbm [thread:$0]  %s1016_s13, 2048, %s1838_s5, [#allocation4], %s1689_s26, %s1689_s26, %s1690_s27  }
 0x150   :  { %v1793_v18 = vld [vmem:[%s1837_s4] ss:$0 sm:$0xff]  ;;  %s1693_s4 = smov [#allocation9]  }
 0x151   :  { %s1027_s5 = sshll.u32 %s1693_s4, 4  ;;  %s1028_s5 = int_to_ptr.vmem [resolvable:$true] %s1027_s5 }
 0x152   :  { %s1659_s19 = scalar_lea.vmem %s1028_s5, 2048  ;;  %p1664_p7 = scmp.lt.s32.totalorder %s1028_s5, %s1028_s5 }
 0x153   :  { %p1660_p6 = scmp.ne.s32.totalorder %s1028_s5, %s1659_s19  ;;  %p1665_p8 = scmp.lt.s32.totalorder %s1659_s19, %s1659_s19 }
 0x155   :  { %p1666_p9 = por %p1665_p8, %p1664_p7 }
 0x157   :  { %p1667_p10 = pnand %p1666_p9, %p1660_p6 }
 0x1d5   :  { %v1510_v33 = vpop.f32.mrf.mxu1 }
 0x1d6   :  { %v588_v21 = vadd.f32 %v1510_v33, %v1793_v18 }
 0x1d7   :  { %v579_v19 = vpop.f32.mrf.mxu1 }
 0x1d8   :  { %v580_v24 = vadd.f32 %v1793_v18, %v579_v19 }
 0x1d9   :  { %v1511_v20 = vpop.f32.mrf.mxu1 }
 0x1da   :  { %v591_v22 = vadd.f32 %v1511_v20, %v1793_v18 }
 0x1db   :  { %v582_v23 = vpop.f32.mrf.mxu1 }
 0x1dc   :  { %v1294_v25 = vpack.c.bf16 %v591_v22, %v588_v21  ;;  %v583_v26 = vadd.f32 %v1793_v18, %v582_v23 }
 0x1dd   :  { %v1514_v27 = vpop.f32.mrf.mxu1 }
 0x1de   :  { %1381 = vst [vmem:[#allocation9 + $0x8] sm:$0xff] %v1294_v25   ;;  %v1289_v28 = vpack.c.bf16 %v583_v26, %v580_v24  ;;  %v604_v31 = vadd.f32 %v1514_v27, %v1793_v18 }
 0x1df   :  { %v595_v29 = vpop.f32.mrf.mxu1 }
 0x1e0   :  { %1290 = vst [vmem:[#allocation9] sm:$0xff] %v1289_v28   ;;  %v596_v35 = vadd.f32 %v1793_v18, %v595_v29 }
 0x1e1   :  { %v1515_v30 = vpop.f32.mrf.mxu1 }
 0x1e2   :  { %v607_v32 = vadd.f32 %v1515_v30, %v1793_v18 }
 0x1e3   :  { %v598_v34 = vpop.f32.mrf.mxu1 }
 0x1e4   :  { %v1304_v36 = vpack.c.bf16 %v607_v32, %v604_v31  ;;  %v599_v37 = vadd.f32 %v1793_v18, %v598_v34 }
 0x1e5   :  { %v1518_v38 = vpop.f32.mrf.mxu1 }
 0x1e6   :  { %1383 = vst [vmem:[#allocation9 + $0x18] sm:$0xff] %v1304_v36   ;;  %v1299_v39 = vpack.c.bf16 %v599_v37, %v596_v35  ;;  %v620_v42 = vadd.f32 %v1518_v38, %v1793_v18 }
 0x1e7   :  { %v611_v40 = vpop.f32.mrf.mxu1 }
 0x1e8   :  { %1382 = vst [vmem:[#allocation9 + $0x10] sm:$0xff] %v1299_v39   ;;  %v612_v45 = vadd.f32 %v1793_v18, %v611_v40 }
 0x1e9   :  { %v1519_v41 = vpop.f32.mrf.mxu1 }
 0x1ea   :  { %v623_v43 = vadd.f32 %v1519_v41, %v1793_v18 }
 0x1eb   :  { %v614_v44 = vpop.f32.mrf.mxu1 }
 0x1ec   :  { %v1314_v46 = vpack.c.bf16 %v623_v43, %v620_v42  ;;  %v615_v47 = vadd.f32 %v1793_v18, %v614_v44 }
 0x1ed   :  { %v1522_v48 = vpop.f32.mrf.mxu1 }
 0x1ee   :  { %1385 = vst [vmem:[#allocation9 + $0x28] sm:$0xff] %v1314_v46   ;;  %v1309_v49 = vpack.c.bf16 %v615_v47, %v612_v45  ;;  %v636_v52 = vadd.f32 %v1522_v48, %v1793_v18 }
 0x1ef   :  { %v627_v50 = vpop.f32.mrf.mxu1 }
 0x1f0   :  { %1384 = vst [vmem:[#allocation9 + $0x20] sm:$0xff] %v1309_v49   ;;  %v628_v55 = vadd.f32 %v1793_v18, %v627_v50 }
 0x1f1   :  { %v1523_v51 = vpop.f32.mrf.mxu1 }
 0x1f2   :  { %v639_v53 = vadd.f32 %v1523_v51, %v1793_v18 }
 0x1f3   :  { %v630_v54 = vpop.f32.mrf.mxu1 }
 0x1f4   :  { %v1324_v56 = vpack.c.bf16 %v639_v53, %v636_v52  ;;  %v631_v57 = vadd.f32 %v1793_v18, %v630_v54 }
 0x1f5   :  { %v1526_v58 = vpop.f32.mrf.mxu1 }
 0x1f6   :  { %1387 = vst [vmem:[#allocation9 + $0x38] sm:$0xff] %v1324_v56   ;;  %v1319_v59 = vpack.c.bf16 %v631_v57, %v628_v55  ;;  %v652_v62 = vadd.f32 %v1526_v58, %v1793_v18 }
 0x1f7   :  { %v643_v60 = vpop.f32.mrf.mxu1 }
 0x1f8   :  { %1386 = vst [vmem:[#allocation9 + $0x30] sm:$0xff] %v1319_v59   ;;  %v644_v1 = vadd.f32 %v1793_v18, %v643_v60 }
 0x1f9   :  { %v1527_v61 = vpop.f32.mrf.mxu1 }
 0x1fa   :  { %v655_v63 = vadd.f32 %v1527_v61, %v1793_v18 }
 0x1fb   :  { %v646_v0 = vpop.f32.mrf.mxu1 }
 0x1fc   :  { %v1334_v2 = vpack.c.bf16 %v655_v63, %v652_v62  ;;  %v647_v3 = vadd.f32 %v1793_v18, %v646_v0 }
 0x1fd   :  { %v1530_v4 = vpop.f32.mrf.mxu1 }
 0x1fe   :  { %1389 = vst [vmem:[#allocation9 + $0x48] sm:$0xff] %v1334_v2   ;;  %v1329_v5 = vpack.c.bf16 %v647_v3, %v644_v1  ;;  %v668_v8 = vadd.f32 %v1530_v4, %v1793_v18 }
 0x1ff   :  { %v659_v6 = vpop.f32.mrf.mxu1 }
 0x200   :  { %1388 = vst [vmem:[#allocation9 + $0x40] sm:$0xff] %v1329_v5   ;;  %v660_v11 = vadd.f32 %v1793_v18, %v659_v6 }
 0x201   :  { %v1531_v7 = vpop.f32.mrf.mxu1 }
 0x202   :  { %v671_v9 = vadd.f32 %v1531_v7, %v1793_v18 }
 0x203   :  { %v662_v10 = vpop.f32.mrf.mxu1 }
 0x204   :  { %v1344_v12 = vpack.c.bf16 %v671_v9, %v668_v8  ;;  %v663_v13 = vadd.f32 %v1793_v18, %v662_v10 }
 0x205   :  { %v1534_v14 = vpop.f32.mrf.mxu1 }
 0x206   :  { %1391 = vst [vmem:[#allocation9 + $0x58] sm:$0xff] %v1344_v12   ;;  %v1339_v15 = vpack.c.bf16 %v663_v13, %v660_v11  ;;  %v684_v33 = vadd.f32 %v1534_v14, %v1793_v18 }
 0x207   :  { %v675_v16 = vpop.f32.mrf.mxu1 }
 0x208   :  { %1390 = vst [vmem:[#allocation9 + $0x50] sm:$0xff] %v1339_v15   ;;  %v676_v21 = vadd.f32 %v1793_v18, %v675_v16 }
 0x209   :  { %v1535_v17 = vpop.f32.mrf.mxu1 }
 0x20a   :  { %v687_v19 = vadd.f32 %v1535_v17, %v1793_v18 }
 0x20b   :  { %v678_v20 = vpop.f32.mrf.mxu1 }
 0x20c   :  { %v1354_v22 = vpack.c.bf16 %v687_v19, %v684_v33  ;;  %v679_v23 = vadd.f32 %v1793_v18, %v678_v20 }
 0x20d   :  { %v1538_v24 = vpop.f32.mrf.mxu1 }
 0x20e   :  { %1393 = vst [vmem:[#allocation9 + $0x68] sm:$0xff] %v1354_v22   ;;  %v1349_v25 = vpack.c.bf16 %v679_v23, %v676_v21  ;;  %v700_v28 = vadd.f32 %v1538_v24, %v1793_v18 }
 0x20f   :  { %v691_v26 = vpop.f32.mrf.mxu1 }
 0x210   :  { %1392 = vst [vmem:[#allocation9 + $0x60] sm:$0xff] %v1349_v25   ;;  %v692_v31 = vadd.f32 %v1793_v18, %v691_v26 }
 0x211   :  { %v1539_v27 = vpop.f32.mrf.mxu1 }
 0x212   :  { %v703_v29 = vadd.f32 %v1539_v27, %v1793_v18 }
 0x213   :  { %v694_v30 = vpop.f32.mrf.mxu1 }
 0x214   :  { %v1364_v32 = vpack.c.bf16 %v703_v29, %v700_v28  ;;  %v695_v34 = vadd.f32 %v1793_v18, %v694_v30 }
 0x216   :  { %1395 = vst [vmem:[#allocation9 + $0x78] sm:$0xff] %v1364_v32   ;;  %v1359_v35 = vpack.c.bf16 %v695_v34, %v692_v31 }
 0x218   :  { %1394 = vst [vmem:[#allocation9 + $0x70] sm:$0xff] %v1359_v35  }
 0x219   :  { %1670 = shalt.err (!%p1667_p10)
}
 0x21a   :  { %1033 = dma.vmem_to_hbm [thread:$0]  %s1028_s5, 2048, %s1839_s6, [#allocation10], %s1689_s26, %s1689_s26, %s1690_s27  }
 0x21b   :  { %1683 = dma.done.wait [#allocation4], 2048  }
 0x21c   :  { %1684 = vsyncadd [#allocation4], 4294965248 }
 0x21d   :  { %1685 = dma.done.wait [#allocation10], 2048  }
 0x21e   :  { %1686 = vsyncadd [#allocation10], 4294965248 }
 0x21f   :  { %1040 = vsyncpa [#allocation3], 1 }
 0x220   :  { %1041 = vsyncpa [#allocation6], 1 }
 0x221   :  { %1042 = vsyncpa [#allocation4], 1 }
 0x222   :  { %1043 = vsyncpa [#allocation10], 1 }

</bundles_post_ra>
